<compile_context>
chip_gen: v6e
topology: v6e:2x2x1
jax: 0.10.0
libtpu: 0.0.40
codegen_flags: <defaults>
</compile_context>

<pallas_src>
import functools

import jax
import jax.numpy as jnp
from jax.experimental import pallas as pl
from jax.experimental.pallas import tpu as pltpu

# --------------------------------------------------------------------------
# Model hyper-parameters (small, consistent with the module's defaults' role)
# --------------------------------------------------------------------------
LATENT_DIM = 32
HIDDEN = 128
CHANNELS = 4
IMG_SIZE = 16
OUT_DIM = CHANNELS * IMG_SIZE        # int(np.prod(img_shape)) = 64
OUT_PAD = 128                        # lane-dense padded output width
BATCH = 8

_SINGLE_PROGRAM_MAX = 512            # whole batch in one program on 1-TC chips
_MAX_TILE_B = 2048                   # per-step tile cap for huge batches


def _round_up(x, m):
    return ((x + m - 1) // m) * m


def _num_tensorcores():
    """Heuristic TC count per chip (v7x has 2; v5e/v6e have 1)."""
    try:
        kind = jax.devices()[0].device_kind.lower()
        return 2 if "v7" in kind else 1
    except Exception:
        return 1


def _elementwise_dtype():
    """bf16 element-wise math on chips with a bf16 VPU/EUP; f32 otherwise."""
    try:
        kind = jax.devices()[0].device_kind.lower()
        if any(old in kind for old in ("v2", "v3", "v4", "v5")):
            return jnp.float32          # no bf16 VPU/EUP on these generations
        return jnp.bfloat16              # v6e / v7x
    except Exception:
        return jnp.float32


_NUM_TC = _num_tensorcores()
_EW_DTYPE = _elementwise_dtype()


def _choose_tiling(batch):
    """Returns (tile_b, padded_batch)."""
    if _NUM_TC >= 2 and batch >= 64:
        # >=2 parallel grid steps so both TensorCores do work (v7x).
        tile = min(_MAX_TILE_B, _round_up(pl.cdiv(batch, _NUM_TC), 8))
        return tile, _round_up(batch, tile)
    if batch <= _SINGLE_PROGRAM_MAX:
        padded = _round_up(batch, 8)             # sublane alignment
        return padded, padded                    # grid = (1,)
    # 1-TC chips, big batch: large tiles keep the serial grid loop short.
    return _MAX_TILE_B, _round_up(batch, _MAX_TILE_B)


# --------------------------------------------------------------------------
# Pallas kernel: whole MLP fused.  Matmuls on the MXU (bf16 in / f32 acc),
# element-wise math on the VPU/EUP in `ew_dtype` (bf16 on v6e/v7x, f32 on v5e).
# --------------------------------------------------------------------------
def generator_kernel(z_ref, w1_ref, b1_ref, w2_ref, b2_ref, w3_ref, b3_ref,
                     out_ref, *, ew_dtype):
    # ---- Linear(latent_dim, 128) + LeakyReLU(0.2)   (block(..., normalize=False))
    z = z_ref[...].astype(jnp.bfloat16)
    h = jnp.dot(z, w1_ref[...], preferred_element_type=jnp.float32)
    h = (h + b1_ref[...]).astype(ew_dtype)
    h = jnp.maximum(h, 0.2 * h)                  # == LeakyReLU(0.2)

    # ---- Tanh
    h = jnp.tanh(h)

    # ---- Linear(128, 128) + Tanh
    h = jnp.dot(h.astype(jnp.bfloat16), w2_ref[...],
                preferred_element_type=jnp.float32)
    h = jnp.tanh((h + b2_ref[...]).astype(ew_dtype))

    # ---- Linear(128, OUT_PAD)   (columns >= OUT_DIM are zero-padded)
    o = jnp.dot(h.astype(jnp.bfloat16), w3_ref[...],
                preferred_element_type=jnp.float32)
    o = o + b3_ref[...]

    out_ref[...] = o.astype(out_ref.dtype)       # full-lane (128-wide) store


# --------------------------------------------------------------------------
# One-time parameter preparation (hoisted out of the forward pass):
#   * weights cast to bf16 (MXU operand dtype)
#   * last layer zero-padded from 64 -> 128 output columns (lane-dense stores)
# --------------------------------------------------------------------------
def prepare_params(params):
    w1, b1, w2, b2, w3, b3 = params
    w1b = w1.astype(jnp.bfloat16)
    w2b = w2.astype(jnp.bfloat16)
    w3b = jnp.zeros((HIDDEN, OUT_PAD), jnp.bfloat16)
    w3b = w3b.at[:, :OUT_DIM].set(w3.astype(jnp.bfloat16))
    b3p = jnp.zeros((1, OUT_PAD), jnp.float32).at[:, :OUT_DIM].set(b3)
    return (w1b, b1, w2b, b2, w3b, b3p)


# --------------------------------------------------------------------------
# Wrapper: tiling + pallas_call.  Takes PREPARED params (see prepare_params).
# --------------------------------------------------------------------------
@jax.jit
def generator_forward(z, prepared_params):
    """z: (B, LATENT_DIM) float32 -> img: (B, CHANNELS, IMG_SIZE) float32."""
    w1b, b1, w2b, b2, w3b, b3p = prepared_params
    batch = z.shape[0]

    tile_b, batch_pad = _choose_tiling(batch)
    z_in = z if batch_pad == batch else jnp.pad(z, ((0, batch_pad - batch), (0, 0)))

    full = lambda shape: pl.BlockSpec(shape, lambda i: (0, 0))  # VMEM-resident

    kernel = functools.partial(generator_kernel, ew_dtype=_EW_DTYPE)

    flat = pl.pallas_call(
        kernel,
        out_shape=jax.ShapeDtypeStruct((batch_pad, OUT_PAD), jnp.float32),
        grid_spec=pltpu.PrefetchScalarGridSpec(
            num_scalar_prefetch=0,
            grid=(batch_pad // tile_b,),
            in_specs=[
                pl.BlockSpec((tile_b, LATENT_DIM), lambda i: (i, 0)),  # z tile
                full((LATENT_DIM, HIDDEN)),                            # w1 (bf16)
                full((1, HIDDEN)),                                     # b1
                full((HIDDEN, HIDDEN)),                                # w2 (bf16)
                full((1, HIDDEN)),                                     # b2
                full((HIDDEN, OUT_PAD)),                               # w3 padded
                full((1, OUT_PAD)),                                    # b3 padded
            ],
            out_specs=pl.BlockSpec((tile_b, OUT_PAD), lambda i: (i, 0)),
        ),
        compiler_params=pltpu.CompilerParams(
            dimension_semantics=("parallel",)),
    )(z_in, w1b, b1, w2b, b2, w3b, b3p)

    # API-boundary only: drop padding + img.view(B, *img_shape)
    out = flat[:batch, :OUT_DIM]
    return out.reshape(batch, CHANNELS, IMG_SIZE)


# --------------------------------------------------------------------------
# Deterministic parameter init (mimics nn.Linear's U(-1/sqrt(fan_in), +...)).
# Weights stored transposed vs. PyTorch: (in_features, out_features).
# --------------------------------------------------------------------------
def init_params(key):
    def linear(key, fan_in, fan_out):
        kw, kb = jax.random.split(key)
        bound = 1.0 / jnp.sqrt(jnp.float32(fan_in))
        w = jax.random.uniform(kw, (fan_in, fan_out), jnp.float32,
                               minval=-bound, maxval=bound)
        b = jax.random.uniform(kb, (1, fan_out), jnp.float32,
                               minval=-bound, maxval=bound)
        return w, b

    k1, k2, k3 = jax.random.split(key, 3)
    w1, b1 = linear(k1, LATENT_DIM, HIDDEN)
    w2, b2 = linear(k2, HIDDEN, HIDDEN)
    w3, b3 = linear(k3, HIDDEN, OUT_DIM)
    return (w1, b1, w2, b2, w3, b3)


# --------------------------------------------------------------------------
# Pure-JAX f32 reference (kernel uses bf16 matmuls and possibly bf16
# element-wise math, so the tolerance is relaxed accordingly).
# --------------------------------------------------------------------------
def reference_forward(z, params):
    w1, b1, w2, b2, w3, b3 = params
    h = z @ w1 + b1
    h = jnp.where(h > 0, h, 0.2 * h)
    h = jnp.tanh(h)
    h = jnp.tanh(h @ w2 + b2)
    o = h @ w3 + b3
    return o.reshape(z.shape[0], CHANNELS, IMG_SIZE)


if __name__ == "__main__":
    key = jax.random.PRNGKey(0)
    kp, kz = jax.random.split(key)
    params = init_params(kp)
    prepared = prepare_params(params)            # one-time weight layout prep
    z = jax.random.normal(kz, (BATCH, LATENT_DIM), dtype=jnp.float32)

    img = generator_forward(z, prepared)
    img = jax.block_until_ready(img)

    ref = reference_forward(z, params)
    assert img.shape == (BATCH, CHANNELS, IMG_SIZE)
    max_err = float(jnp.max(jnp.abs(img - ref)))
    assert max_err < 5e-2, f"max abs error {max_err} too large"

    print("KERNEL_OK")
</pallas_src>

<mosaic_0001>
module attributes {stable_mosaic.version = 11 : i64} {
  func.func @generator_kernel(%arg0: i32, %arg1: memref<8x32xf32, #tpu.memory_space<vmem>>, %arg2: memref<32x128xbf16, #tpu.memory_space<vmem>>, %arg3: memref<1x128xf32, #tpu.memory_space<vmem>>, %arg4: memref<128x128xbf16, #tpu.memory_space<vmem>>, %arg5: memref<1x128xf32, #tpu.memory_space<vmem>>, %arg6: memref<128x128xbf16, #tpu.memory_space<vmem>>, %arg7: memref<1x128xf32, #tpu.memory_space<vmem>>, %arg8: memref<8x128xf32, #tpu.memory_space<vmem>>) attributes {dimension_semantics = [#tpu.dimension_semantics<parallel>], iteration_bounds = array<i64: 1>, scalar_prefetch = 0 : i64, scratch_operands = 0 : i64, tpu.core_type = #tpu.core_type<tc>, window_params = [{transform_indices = @transform_0, window_bounds = array<i64: 8, 32>}, {pipeline_mode = #tpu.pipeline_mode<synchronous>, transform_indices = @transform_1, window_bounds = array<i64: 32, 128>}, {pipeline_mode = #tpu.pipeline_mode<synchronous>, transform_indices = @transform_2, window_bounds = array<i64: 1, 128>}, {pipeline_mode = #tpu.pipeline_mode<synchronous>, transform_indices = @transform_3, window_bounds = array<i64: 128, 128>}, {pipeline_mode = #tpu.pipeline_mode<synchronous>, transform_indices = @transform_4, window_bounds = array<i64: 1, 128>}, {pipeline_mode = #tpu.pipeline_mode<synchronous>, transform_indices = @transform_5, window_bounds = array<i64: 128, 128>}, {pipeline_mode = #tpu.pipeline_mode<synchronous>, transform_indices = @transform_6, window_bounds = array<i64: 1, 128>}, {transform_indices = @transform_7, window_bounds = array<i64: 8, 128>}]} {
    %c0 = arith.constant 0 : index
    %c0_0 = arith.constant 0 : index
    %0 = vector.load %arg1[%c0, %c0_0] : memref<8x32xf32, #tpu.memory_space<vmem>>, vector<8x32xf32>
    %1 = arith.truncf %0 : vector<8x32xf32> to vector<8x32xbf16>
    %c0_1 = arith.constant 0 : index
    %c0_2 = arith.constant 0 : index
    %2 = vector.load %arg2[%c0_1, %c0_2] : memref<32x128xbf16, #tpu.memory_space<vmem>>, vector<32x128xbf16>
    %cst = arith.constant dense<0.000000e+00> : vector<8x128xf32>
    %3 = tpu.matmul %1, %2, %cst {dimension_numbers = #tpu.dot_dimension_numbers<[1], [0], [0], [1], [0, 0, 1, 1], [], []>} : vector<8x32xbf16>, vector<32x128xbf16>, vector<8x128xf32> -> vector<8x128xf32>
    %c0_3 = arith.constant 0 : index
    %c0_4 = arith.constant 0 : index
    %4 = vector.load %arg3[%c0_3, %c0_4] : memref<1x128xf32, #tpu.memory_space<vmem>>, vector<1x128xf32>
    %5 = vector.broadcast %4 : vector<1x128xf32> to vector<8x128xf32>
    %6 = arith.addf %3, %5 : vector<8x128xf32>
    %7 = arith.truncf %6 : vector<8x128xf32> to vector<8x128xbf16>
    %cst_5 = arith.constant 2.001950e-01 : bf16
    %8 = vector.broadcast %cst_5 : bf16 to vector<8x128xbf16>
    %9 = arith.mulf %8, %7 : vector<8x128xbf16>
    %10 = arith.maximumf %7, %9 : vector<8x128xbf16>
    %11 = math.tanh %10 : vector<8x128xbf16>
    %c0_6 = arith.constant 0 : index
    %c0_7 = arith.constant 0 : index
    %12 = vector.load %arg4[%c0_6, %c0_7] : memref<128x128xbf16, #tpu.memory_space<vmem>>, vector<128x128xbf16>
    %cst_8 = arith.constant dense<0.000000e+00> : vector<8x128xf32>
    %13 = tpu.matmul %11, %12, %cst_8 {dimension_numbers = #tpu.dot_dimension_numbers<[1], [0], [0], [1], [0, 0, 1, 1], [], []>} : vector<8x128xbf16>, vector<128x128xbf16>, vector<8x128xf32> -> vector<8x128xf32>
    %c0_9 = arith.constant 0 : index
    %c0_10 = arith.constant 0 : index
    %14 = vector.load %arg5[%c0_9, %c0_10] : memref<1x128xf32, #tpu.memory_space<vmem>>, vector<1x128xf32>
    %15 = vector.broadcast %14 : vector<1x128xf32> to vector<8x128xf32>
    %16 = arith.addf %13, %15 : vector<8x128xf32>
    %17 = arith.truncf %16 : vector<8x128xf32> to vector<8x128xbf16>
    %18 = math.tanh %17 : vector<8x128xbf16>
    %c0_11 = arith.constant 0 : index
    %c0_12 = arith.constant 0 : index
    %19 = vector.load %arg6[%c0_11, %c0_12] : memref<128x128xbf16, #tpu.memory_space<vmem>>, vector<128x128xbf16>
    %cst_13 = arith.constant dense<0.000000e+00> : vector<8x128xf32>
    %20 = tpu.matmul %18, %19, %cst_13 {dimension_numbers = #tpu.dot_dimension_numbers<[1], [0], [0], [1], [0, 0, 1, 1], [], []>} : vector<8x128xbf16>, vector<128x128xbf16>, vector<8x128xf32> -> vector<8x128xf32>
    %c0_14 = arith.constant 0 : index
    %c0_15 = arith.constant 0 : index
    %21 = vector.load %arg7[%c0_14, %c0_15] : memref<1x128xf32, #tpu.memory_space<vmem>>, vector<1x128xf32>
    %22 = vector.broadcast %21 : vector<1x128xf32> to vector<8x128xf32>
    %23 = arith.addf %20, %22 : vector<8x128xf32>
    %c0_16 = arith.constant 0 : index
    %c0_17 = arith.constant 0 : index
    %24 = vector.load %arg8[%c0_16, %c0_17] : memref<8x128xf32, #tpu.memory_space<vmem>>, vector<8x128xf32>
    tpu.vector_store %arg8[%c0_16, %c0_17], %23 {strides = array<i32>} : memref<8x128xf32, #tpu.memory_space<vmem>>, vector<8x128xf32>,
    return
  }
  func.func @transform_0(%arg0: i32) -> (i32, i32) {
    %c0_i32 = arith.constant 0 : i32
    %c0_i32_0 = arith.constant 0 : i32
    return %arg0, %c0_i32 : i32, i32
  }
  func.func @transform_1(%arg0: i32) -> (i32, i32) {
    %c0_i32 = arith.constant 0 : i32
    %c0_i32_0 = arith.constant 0 : i32
    %c0_i32_1 = arith.constant 0 : i32
    return %c0_i32, %c0_i32_0 : i32, i32
  }
  func.func @transform_2(%arg0: i32) -> (i32, i32) {
    %c0_i32 = arith.constant 0 : i32
    %c0_i32_0 = arith.constant 0 : i32
    %c0_i32_1 = arith.constant 0 : i32
    return %c0_i32, %c0_i32_0 : i32, i32
  }
  func.func @transform_3(%arg0: i32) -> (i32, i32) {
    %c0_i32 = arith.constant 0 : i32
    %c0_i32_0 = arith.constant 0 : i32
    %c0_i32_1 = arith.constant 0 : i32
    return %c0_i32, %c0_i32_0 : i32, i32
  }
  func.func @transform_4(%arg0: i32) -> (i32, i32) {
    %c0_i32 = arith.constant 0 : i32
    %c0_i32_0 = arith.constant 0 : i32
    %c0_i32_1 = arith.constant 0 : i32
    return %c0_i32, %c0_i32_0 : i32, i32
  }
  func.func @transform_5(%arg0: i32) -> (i32, i32) {
    %c0_i32 = arith.constant 0 : i32
    %c0_i32_0 = arith.constant 0 : i32
    %c0_i32_1 = arith.constant 0 : i32
    return %c0_i32, %c0_i32_0 : i32, i32
  }
  func.func @transform_6(%arg0: i32) -> (i32, i32) {
    %c0_i32 = arith.constant 0 : i32
    %c0_i32_0 = arith.constant 0 : i32
    %c0_i32_1 = arith.constant 0 : i32
    return %c0_i32, %c0_i32_0 : i32, i32
  }
  func.func @transform_7(%arg0: i32) -> (i32, i32) {
    %c0_i32 = arith.constant 0 : i32
    %c0_i32_0 = arith.constant 0 : i32
    return %arg0, %c0_i32 : i32, i32
  }
}

</mosaic_0001>

<bundles_post_ra>
// kernel: generator_forward.1
= control target key start
LH: loop header
LB: loop body
LE: loop exit
PB: predicated region body
PF: predicated region fallthrough
CT: control target
= control target key end

     0   :  { %12 = vsyncpa [#allocation3], 0  ;;  %s698_s0 = inlined_call_operand.hbm [shape: f32[8,32], index: 0, kind: input, shape index: {}]   ;;  %s699_s1 = inlined_call_operand.hbm [shape: bf16[32,128], index: 1, kind: input, shape index: {}]   ;;  %s700_s2 = inlined_call_operand.vmem [shape: f32[1,128], index: 2, kind: input, shape index: {}]   ;;  %s701_s3 = inlined_call_operand.hbm [shape: bf16[128,128], index: 3, kind: input, shape index: {}]   ;;  %s702_s4 = inlined_call_operand.vmem [shape: f32[1,128], index: 4, kind: input, shape index: {}]   ;;  %s703_s5 = inlined_call_operand.hbm [shape: bf16[128,128], index: 5, kind: input, shape index: {}]   ;;  %s704_s6 = inlined_call_operand.vmem [shape: f32[1,128], index: 6, kind: input, shape index: {}]   ;;  %s705_s7 = inlined_call_operand.vmem [shape: f32[8,128], index: 7, kind: output, shape index: {}]  }
   0x1   :  { %13 = vsyncpa [#allocation5], 0 }
   0x2   :  { %14 = vsyncpa [#allocation8], 0  ;;  %s593_s24 = smov [#allocation4]  }
   0x3   :  { %s30_s25 = sshll.u32 %s593_s24, 4  ;;  %s31_s25 = int_to_ptr.vmem [resolvable:$true] %s30_s25 }
   0x4   :  { %s515_s26 = scalar_lea.vmem %s31_s25, 256  ;;  %p520_p1 = scmp.lt.s32.totalorder %s31_s25, %s31_s25 }
   0x5   :  { %p516_p0 = scmp.ne.s32.totalorder %s31_s25, %s515_s26  ;;  %p521_p2 = scmp.lt.s32.totalorder %s515_s26, %s515_s26 }
   0x7   :  { %p522_p3 = por %p521_p2, %p520_p1 }
   0x9   :  { %p523_p4 = pnand %p522_p3, %p516_p0 }
   0xb   :  { %526 = shalt.err (!%p523_p4)
}
   0xc   :  { %s594_s27 = smov 64   ;;  %s595_s28 = smov 4  }
   0xd   :  { %36 = dma.hbm_to_vmem [thread:$0]  %s699_s1, 256, %s31_s25, [#allocation5], %s594_s27, %s594_s27, %s595_s28  }
   0xe   :  { %s596_s8 = smov [#allocation2]   ;;  %s597_s10 = smov [#allocation6]  }
   0xf   :  { %s21_s9 = sshll.u32 %s596_s8, 4  ;;  %s44_s11 = sshll.u32 %s597_s10, 4  ;;  %s22_s9 = int_to_ptr.vmem [resolvable:$true] %s21_s9  ;;  %s45_s11 = int_to_ptr.vmem [resolvable:$true] %s44_s11 }
  0x10   :  { %s535_s12 = scalar_lea.vmem %s22_s9, 128  ;;  %p540_p6 = scmp.lt.s32.totalorder %s22_s9, %s22_s9 }
  0x11   :  { %p536_p5 = scmp.ne.s32.totalorder %s22_s9, %s535_s12  ;;  %p541_p7 = scmp.lt.s32.totalorder %s535_s12, %s535_s12 }
  0x13   :  { %p542_p8 = por %p541_p7, %p540_p6 }
  0x15   :  { %p543_p9 = pnand %p542_p8, %p536_p5 }
  0x17   :  { %546 = shalt.err (!%p543_p9)
}
  0x18   :  { %24 = dma.hbm_to_vmem [thread:$0]  %s698_s0, 128, %s22_s9, [#allocation3]  }
  0x19   :  { %s555_s15 = scalar_lea.vmem %s45_s11, 1024  ;;  %p560_p11 = scmp.lt.s32.totalorder %s45_s11, %s45_s11 }
  0x1a   :  { %p556_p10 = scmp.ne.s32.totalorder %s45_s11, %s555_s15  ;;  %p561_p12 = scmp.lt.s32.totalorder %s555_s15, %s555_s15 }
  0x1c   :  { %p562_p13 = por %p561_p12, %p560_p11 }
  0x1e   :  { %p563_p0 = pnand %p562_p13, %p556_p10 }
  0x20   :  { %566 = shalt.err (!%p563_p0)
}
  0x21   :  { %50 = dma.hbm_to_vmem [thread:$0]  %s701_s3, 1024, %s45_s11, [#allocation5], %s594_s27, %s594_s27, %s595_s28  }
  0x22   :  { %s598_s17 = smov [#allocation7]  }
  0x23   :  { %s58_s18 = sshll.u32 %s598_s17, 4  ;;  %s59_s18 = int_to_ptr.vmem [resolvable:$true] %s58_s18 }
  0x24   :  { %s575_s19 = scalar_lea.vmem %s59_s18, 1024  ;;  %p580_p2 = scmp.lt.s32.totalorder %s59_s18, %s59_s18 }
  0x25   :  { %p576_p1 = scmp.ne.s32.totalorder %s59_s18, %s575_s19  ;;  %p581_p3 = scmp.lt.s32.totalorder %s575_s19, %s575_s19 }
  0x27   :  { %p582_p4 = por %p581_p3, %p580_p2 }
  0x29   :  { %p583_p5 = pnand %p582_p4, %p576_p1 }
  0x2b   :  { %586 = shalt.err (!%p583_p5)
}
  0x2c   :  { %64 = dma.hbm_to_vmem [thread:$0]  %s703_s5, 1024, %s59_s18, [#allocation8], %s594_s27, %s594_s27, %s595_s28  }
  0x2d   :  { %587 = dma.done.wait [#allocation3], 128  }
  0x2e   :  { %588 = vsyncadd [#allocation3], 4294967168 }
  0x2f   :  { %589 = dma.done.wait [#allocation5], 1280  }
  0x30   :  { %590 = vsyncadd [#allocation5], 4294966016 }
  0x31   :  { %591 = dma.done.wait [#allocation8], 1024  }
  0x32   :  { %592 = vsyncadd [#allocation8], 4294966272  ;;  %v599_v0 = vmov 0.0   ;;  %vm600_vm0 = vmmov 0   ;;  %v485_v1 = vld [vmem:[#allocation4 + $0x8] sm:$0xff]   ;;  %v486_v2 = vld [vmem:[#allocation4] sm:$0xff]  }
  0x33   :  { %429 = vmatprep.subr.bf16.mxu0 %v599_v0  ;;  %433 = vmatprep.mubr.msk.bf16.mxu0 %vm600_vm0, %v599_v0  ;;  %v81_v3 = vld [vmem:[#allocation2] sm:$0xff]  ;;  %v487_v4 = vld [vmem:[#allocation6 + $0x38] sm:$0xff]   ;;  %vm106_vm1 = vcmask 261120   ;;  %v488_v5 = vld [vmem:[#allocation6 + $0x30] sm:$0xff]  }
  0x34   :  { %437 = vmatprep.subr.bf16.mxu1 %v599_v0  ;;  %453 = vmatprep.mubr.msk.bf16.mxu1 %vm600_vm0, %v599_v0  ;;  %v82_v6 = vpack.c.bf16 %v81_v3, %v81_v3  ;;  %v489_v7 = vld [vmem:[#allocation6 + $0x28] sm:$0xff]   ;;  %v490_v8 = vld [vmem:[#allocation6 + $0x20] sm:$0xff]   ;;  %v491_v9 = vld [vmem:[#allocation6 + $0x18] sm:$0xff]  }
  0x35   :  { %430 = vmatpush3.bf16.msra.mxu0 %v485_v1  ;;  %438 = vmatpush3.bf16.msra.mxu1 %v487_v4  ;;  %v492_v10 = vld [vmem:[#allocation6 + $0x10] sm:$0xff]   ;;  %v493_v11 = vld [vmem:[#allocation6 + $0x8] sm:$0xff]   ;;  %v494_v12 = vld [vmem:[#allocation6] sm:$0xff]  }
  0x36   :  { %431 = vmatprep.subr.bf16.mxu0 %v599_v0  ;;  %439 = vmatprep.subr.bf16.mxu1 %v599_v0  ;;  %v495_v13 = vld [vmem:[#allocation7 + $0x38] sm:$0xff]   ;;  %v496_v14 = vld [vmem:[#allocation7 + $0x30] sm:$0xff]   ;;  %v497_v15 = vld [vmem:[#allocation7 + $0x28] sm:$0xff]  }
  0x37   :  { %v386_v16 = vld [vmem:[%s700_s2] ss:$0 sm:$0xff]  ;;  %v498_v26 = vld [vmem:[#allocation7 + $0x20] sm:$0xff]   ;;  %v499_v27 = vld [vmem:[#allocation7 + $0x18] sm:$0xff]  }
  0x38   :  { %v500_v28 = vld [vmem:[#allocation7 + $0x10] sm:$0xff]   ;;  %v501_v29 = vld [vmem:[#allocation7 + $0x8] sm:$0xff]   ;;  %v502_v30 = vld [vmem:[#allocation7] sm:$0xff]  }
  0x39   :  { %432 = vmatpush3.bf16.msra.mxu0 %v486_v2  ;;  %440 = vmatpush3.bf16.msra.mxu1 %v488_v5  ;;  %v390_v31 = vld [vmem:[%s702_s4] ss:$0 sm:$0xff] }
  0x3a   :  { %457 = vmatprep.subr.bf16.mxu0 %v599_v0  ;;  %441 = vmatprep.subr.bf16.mxu1 %v599_v0  ;;  %v399_v39 = vld [vmem:[%s704_s6] ss:$0 sm:$0xff] }
  0x3c   :  { %434 = vmatmul.mubr.msk.bf16.vlgmr.msra.gmra.mxu0 %vm106_vm1, %v82_v6 }
  0x3d   :  { %473 = vmatprep.mubr.msk.bf16.mxu0 %vm600_vm0, %v599_v0  ;;  %442 = vmatpush3.bf16.msra.mxu1 %v489_v7 }
  0x3e   :  { %443 = vmatprep.subr.bf16.mxu1 %v599_v0  ;;  %458 = vmatpush3.bf16.msra.mxu0 %v495_v13 }
  0x3f   :  { %459 = vmatprep.subr.bf16.mxu0 %v599_v0 }
  0x41   :  { %444 = vmatpush3.bf16.msra.mxu1 %v490_v8 }
  0x42   :  { %445 = vmatprep.subr.bf16.mxu1 %v599_v0  ;;  %460 = vmatpush3.bf16.msra.mxu0 %v496_v14 }
  0x43   :  { %461 = vmatprep.subr.bf16.mxu0 %v599_v0 }
  0x45   :  { %446 = vmatpush3.bf16.msra.mxu1 %v491_v9 }
  0x46   :  { %447 = vmatprep.subr.bf16.mxu1 %v599_v0  ;;  %462 = vmatpush3.bf16.msra.mxu0 %v497_v15 }
  0x47   :  { %463 = vmatprep.subr.bf16.mxu0 %v599_v0 }
  0x49   :  { %448 = vmatpush3.bf16.msra.mxu1 %v492_v10 }
  0x4a   :  { %449 = vmatprep.subr.bf16.mxu1 %v599_v0  ;;  %464 = vmatpush3.bf16.msra.mxu0 %v498_v26 }
  0x4b   :  { %465 = vmatprep.subr.bf16.mxu0 %v599_v0 }
  0x4d   :  { %450 = vmatpush3.bf16.msra.mxu1 %v493_v11 }
  0x4e   :  { %451 = vmatprep.subr.bf16.mxu1 %v599_v0  ;;  %466 = vmatpush3.bf16.msra.mxu0 %v499_v27 }
  0x4f   :  { %467 = vmatprep.subr.bf16.mxu0 %v599_v0 }
  0x51   :  { %452 = vmatpush3.bf16.msra.mxu1 %v494_v12 }
  0x52   :  { %468 = vmatpush3.bf16.msra.mxu0 %v500_v28 }
  0x53   :  { %469 = vmatprep.subr.bf16.mxu0 %v599_v0 }
  0x56   :  { %470 = vmatpush3.bf16.msra.mxu0 %v501_v29 }
  0x57   :  { %471 = vmatprep.subr.bf16.mxu0 %v599_v0 }
  0x5a   :  { %472 = vmatpush3.bf16.msra.mxu0 %v502_v30 }
  0xfc   :  { %v144_v17 = vpop.f32.mrf.mxu0 }
  0xfd   :  { %v145_v18 = vadd.f32 %v386_v16, %v144_v17 }
  0xfe   :  { %v435_v19 = vpop.f32.mrf.mxu0 }
  0xff   :  { %v150_v20 = vpack.c.bf16 %v145_v18, %v145_v18 }
 0x100   :  { %v147_v21 = vpop.f32.mrf.mxu0 }
 0x101   :  { %v151_v22 = vmul.bf16 1045249613, %v150_v20 }
 0x102   :  { %v436_v23 = vpop.f32.mrf.mxu0 }
 0x103   :  { %v152_v24 = vmax.bf16 %v151_v22, %v150_v20 }
 0x105   :  { %503 = vtanh.bf16 %v152_v24 }
 0x113   :  { %v504_v25 = vpop.eup %503 }
 0x114   :  { %454 = vmatmul.mubr.bf16.vlgmr.msra.gmra.mxu1 %v504_v25 }
 0x1d4   :  { %v259_v32 = vpop.f32.mrf.mxu1 }
 0x1d5   :  { %v260_v33 = vadd.f32 %v390_v31, %v259_v32 }
 0x1d6   :  { %v455_v34 = vpop.f32.mrf.mxu1 }
 0x1d7   :  { %v265_v35 = vpack.c.bf16 %v260_v33, %v260_v33 }
 0x1d8   :  { %v262_v36 = vpop.f32.mrf.mxu1 }
 0x1d9   :  { %505 = vtanh.bf16 %v265_v35 }
 0x1da   :  { %v456_v37 = vpop.f32.mrf.mxu1 }
 0x1e7   :  { %v506_v38 = vpop.eup %505 }
 0x1e8   :  { %474 = vmatmul.mubr.bf16.vlgmr.msra.gmra.mxu0 %v506_v38 }
 0x2a8   :  { %v372_v40 = vpop.f32.mrf.mxu0 }
 0x2a9   :  { %v373_v41 = vadd.f32 %v399_v39, %v372_v40 }
 0x2aa   :  { %v475_v42 = vpop.f32.mrf.mxu0 }
 0x2ab   :  { %378 = vst [vmem:[%s705_s7] sm:$0xff] %v373_v41 }
 0x2ac   :  { %v375_v43 = vpop.f32.mrf.mxu0 }
 0x2ae   :  { %v476_v44 = vpop.f32.mrf.mxu0 }
 0x2af   :  { %383 = vsyncpa [#allocation3], 1 }
 0x2b0   :  { %384 = vsyncpa [#allocation5], 1 }
 0x2b1   :  { %385 = vsyncpa [#allocation8], 1 }

</bundles_post_ra>
